<compile_context>
chip_gen: v7x
topology: tpu7x:2x2x1
jax: 0.10.0
libtpu: 0.0.40
codegen_flags: <defaults>
</compile_context>

<pallas_src>
import functools

import jax
import jax.numpy as jnp
from jax.experimental import pallas as pl
from jax.experimental.pallas import tpu as pltpu

# ---- model hyper-parameters (small, consistent with the module) ----
VOCAB_SIZE = 50
EMB_DIM = 32          # embedding_dim
N_FILTERS = 8         # n_filters
FILTER_SIZES = (3, 4, 5)
HIDDEN_DIM = 32       # fc hidden width
OUTPUT_DIM = 4
BATCH = 2
SEQ = 16              # must be >= max(FILTER_SIZES)

# Set to jnp.bfloat16 on v6e/v7x for native-MXU matmul operands (one-hot is
# exact in bf16; accumulation stays f32 via preferred_element_type).
MATMUL_DTYPE = jnp.float32


def _round_up(x, m):
    return (x + m - 1) // m * m


def slab_layout():
    """Row offsets of each parameter block inside the (total, 128) f32 slab."""
    nb = len(FILTER_SIZES) * N_FILTERS
    max_fs = max(FILTER_SIZES)
    v_pad = _round_up(VOCAB_SIZE, 8)
    r_tab = 0                                   # (v_pad, E)   embedding table
    r_w = r_tab + v_pad                         # (max_fs*E, 3*NF) per-tap conv weights
    r_fc = r_w + max_fs * EMB_DIM               # (3*NF, H)    fc weight
    r_fc1 = r_fc + nb                           # (H, 128)     fc1 weight (lane-padded)
    r_misc = r_fc1 + HIDDEN_DIM                 # 4 rows: conv_b, fc_b, fc1_b, fs/lane
    total = _round_up(r_misc + 4, 8)
    return dict(v_pad=v_pad, r_tab=r_tab, r_w=r_w, r_fc=r_fc, r_fc1=r_fc1,
                r_misc=r_misc, total=total)


def cnn_kernel(ids_ref, p_ref, out_ref, *, BB, S, E, NB, H,
               filter_sizes, lay, matmul_dtype):
    rows = BB * S
    max_fs = max(filter_sizes)
    v_pad = lay["v_pad"]
    mdt = matmul_dtype

    # ---- 1) fused embedding lookup: one-hot gather on the MXU (exact) ----
    ids = ids_ref[...]                                             # (rows, 1) int32
    iota = jax.lax.broadcasted_iota(jnp.int32, (rows, v_pad), 1)   # (rows, v_pad)
    onehot = (iota == ids).astype(mdt)                             # (rows, v_pad)
    table = p_ref[lay["r_tab"]:lay["r_tab"] + v_pad, 0:E]          # (v_pad, E)
    emb = jnp.dot(onehot, table.astype(mdt),
                  preferred_element_type=jnp.float32)              # (rows, E) f32

    # ---- 2) conv branches: per-tap SUBLANE shift + (E, 3*NF) matmul ----
    # shift_up(x, k)[r] = x[r + k] (tail rows zero).  Pure sublane movement;
    # no lane-offset slices.  Tail / cross-sequence rows only ever land on
    # time steps that the validity mask below removes.
    def shift_up(x, k):
        if k == 0:
            return x
        return jnp.concatenate(
            [x[k:, :], jnp.zeros((k, x.shape[1]), x.dtype)], axis=0)

    conv = None
    for k in range(max_fs):
        r0 = lay["r_w"] + k * E
        wk = p_ref[r0:r0 + E, 0:NB]                                # (E, 3*NF)
        part = jnp.dot(shift_up(emb, k).astype(mdt), wk.astype(mdt),
                       preferred_element_type=jnp.float32)         # (rows, 3*NF)
        conv = part if conv is None else conv + part

    conv_b = p_ref[lay["r_misc"]:lay["r_misc"] + 1, 0:NB]          # (1, 3*NF)
    z = jnp.maximum(conv + conv_b, 0.0)                            # one bias + ReLU

    # ---- 3) mask invalid time steps, then max over time per sequence ----
    row_idx = jax.lax.broadcasted_iota(jnp.int32, (rows, NB), 0)
    t_idx = row_idx % S                                            # time within seq
    fs_lane = p_ref[lay["r_misc"] + 3:lay["r_misc"] + 4, 0:NB].astype(jnp.int32)
    valid = t_idx <= (S - fs_lane)                                 # t in [0, S-fs]
    z = jnp.where(valid, z, 0.0)        # ReLU output >= 0, so 0 is a safe fill
    pooled = jnp.max(z.reshape(BB, S, NB), axis=1)                 # (BB, 3*NF)

    # ---- 4) FC head (dropout = identity in eval mode) ----
    fc_w = p_ref[lay["r_fc"]:lay["r_fc"] + NB, 0:H]                # (3*NF, H)
    fc_b = p_ref[lay["r_misc"] + 1:lay["r_misc"] + 2, 0:H]         # (1, H)
    h = jnp.maximum(
        jnp.dot(pooled.astype(mdt), fc_w.astype(mdt),
                preferred_element_type=jnp.float32) + fc_b, 0.0)   # (BB, H)

    # fc1 weight/bias are padded to 128 output lanes in the slab, so the
    # matmul directly yields a lane-dense (BB, 128) tile -> unmasked store.
    fc1_w = p_ref[lay["r_fc1"]:lay["r_fc1"] + H, :]                # (H, 128)
    fc1_b = p_ref[lay["r_misc"] + 2:lay["r_misc"] + 3, :]          # (1, 128)
    out = jnp.dot(h.astype(mdt), fc1_w.astype(mdt),
                  preferred_element_type=jnp.float32) + fc1_b      # (BB, 128)
    out_ref[...] = out.astype(out_ref.dtype)


def pack_params(params, lay=None):
    """One-time packing of all parameters into a single (rows, 128) f32 slab."""
    if lay is None:
        lay = slab_layout()
    nb = len(FILTER_SIZES) * N_FILTERS
    slab = jnp.zeros((lay["total"], 128), jnp.float32)
    # embedding table (rows beyond VOCAB_SIZE stay zero; one-hot never hits them)
    slab = slab.at[lay["r_tab"]:lay["r_tab"] + VOCAB_SIZE, 0:EMB_DIM].set(
        params["vectors"])
    # conv taps: tap k of branch j -> rows [r_w + k*E, ...), lanes [j*NF, (j+1)*NF)
    # (branches shorter than tap k stay zero)
    for j, fs in enumerate(FILTER_SIZES):
        wj = params[f"w{j}"]                                       # (fs, E, NF)
        for k in range(fs):
            r0 = lay["r_w"] + k * EMB_DIM
            slab = slab.at[r0:r0 + EMB_DIM,
                           j * N_FILTERS:(j + 1) * N_FILTERS].set(wj[k])
    slab = slab.at[lay["r_fc"]:lay["r_fc"] + nb, 0:HIDDEN_DIM].set(params["fc_w"])
    slab = slab.at[lay["r_fc1"]:lay["r_fc1"] + HIDDEN_DIM,
                   0:OUTPUT_DIM].set(params["fc1_w"])
    conv_b = jnp.concatenate([params["b0"], params["b1"], params["b2"]], axis=1)[0]
    slab = slab.at[lay["r_misc"], 0:nb].set(conv_b)
    slab = slab.at[lay["r_misc"] + 1, 0:HIDDEN_DIM].set(params["fc_b"][0])
    slab = slab.at[lay["r_misc"] + 2, 0:OUTPUT_DIM].set(params["fc1_b"][0])
    fs_lane = jnp.repeat(jnp.array(FILTER_SIZES, jnp.float32), N_FILTERS)
    slab = slab.at[lay["r_misc"] + 3, 0:nb].set(fs_lane)
    return slab


def cnn_forward(text, slab, *, block_b=None):
    """text: (B, S) int token ids; slab: packed params. Returns (B, OUT) f32."""
    lay = slab_layout()
    B, S = text.shape
    nb = len(FILTER_SIZES) * N_FILTERS

    # batch-block size: multiple of 8 when it does not cover the full batch
    if block_b is None:
        block_b = B
        for cand in (64, 32, 16, 8):
            if B % cand == 0:
                block_b = cand
                break
    assert B % block_b == 0
    assert block_b == B or (block_b * S) % 8 == 0
    grid = (B // block_b,)

    # Wrapper-side layout plumbing only: clamp ids (out-of-range ids would
    # silently embed to zero via the one-hot) and present them as a column.
    ids_col = jnp.clip(text.astype(jnp.int32), 0, VOCAB_SIZE - 1).reshape(B * S, 1)

    kernel = functools.partial(
        cnn_kernel, BB=block_b, S=S, E=EMB_DIM, NB=nb, H=HIDDEN_DIM,
        filter_sizes=FILTER_SIZES, lay=lay, matmul_dtype=MATMUL_DTYPE)

    out_pad = pl.pallas_call(
        kernel,
        out_shape=jax.ShapeDtypeStruct((B, 128), jnp.float32),
        grid_spec=pltpu.PrefetchScalarGridSpec(
            num_scalar_prefetch=0,
            grid=grid,
            in_specs=[
                pl.BlockSpec((block_b * S, 1), lambda i: (i, 0)),   # ids block
                pl.BlockSpec((lay["total"], 128), lambda i: (0, 0)),  # params (resident)
            ],
            out_specs=pl.BlockSpec((block_b, 128), lambda i: (i, 0)),
        ),
        compiler_params=pltpu.CompilerParams(
            dimension_semantics=("parallel",)),   # shards grid steps on v7x's 2 TCs
    )(ids_col, slab)

    return out_pad[:, :OUTPUT_DIM]   # lane-dense store in kernel; slice here


def cnn_reference(text, params):
    """Pure-JAX reference (mirrors the PyTorch module in eval mode)."""
    emb = jnp.take(params["vectors"], text, axis=0)                # (B, S, E)
    B, S, _ = emb.shape
    pooled = []
    for j, fs in enumerate(FILTER_SIZES):
        w, b = params[f"w{j}"], params[f"b{j}"]                    # (fs,E,NF), (1,NF)
        L = S - fs + 1
        conv = jnp.zeros((B, L, N_FILTERS), jnp.float32)
        for k in range(fs):
            conv = conv + jnp.einsum("ble,ef->blf", emb[:, k:k + L, :], w[k],
                                     precision=jax.lax.Precision.HIGHEST)
        conv = jax.nn.relu(conv + b)
        pooled.append(jnp.max(conv, axis=1))
    cat = jnp.concatenate(pooled, axis=-1)
    h = jax.nn.relu(
        jnp.dot(cat, params["fc_w"], precision=jax.lax.Precision.HIGHEST)
        + params["fc_b"])
    return jnp.dot(h, params["fc1_w"],
                   precision=jax.lax.Precision.HIGHEST) + params["fc1_b"]


def init_params(key):
    ks = jax.random.split(key, 12)
    scale = 0.1
    return {
        # frozen embedding table (nn.Embedding.from_pretrained)
        "vectors": jax.random.normal(ks[0], (VOCAB_SIZE, EMB_DIM), jnp.float32),
        # conv_k weight stored as (fs, E, NF) == torch (NF, 1, fs, E) transposed
        "w0": scale * jax.random.normal(ks[1], (FILTER_SIZES[0], EMB_DIM, N_FILTERS), jnp.float32),
        "b0": scale * jax.random.normal(ks[2], (1, N_FILTERS), jnp.float32),
        "w1": scale * jax.random.normal(ks[3], (FILTER_SIZES[1], EMB_DIM, N_FILTERS), jnp.float32),
        "b1": scale * jax.random.normal(ks[4], (1, N_FILTERS), jnp.float32),
        "w2": scale * jax.random.normal(ks[5], (FILTER_SIZES[2], EMB_DIM, N_FILTERS), jnp.float32),
        "b2": scale * jax.random.normal(ks[6], (1, N_FILTERS), jnp.float32),
        # fc: Linear(3*NF, 32) stored as (in, out); fc1: Linear(32, OUTPUT_DIM)
        "fc_w": scale * jax.random.normal(ks[7], (len(FILTER_SIZES) * N_FILTERS, HIDDEN_DIM), jnp.float32),
        "fc_b": scale * jax.random.normal(ks[8], (1, HIDDEN_DIM), jnp.float32),
        "fc1_w": scale * jax.random.normal(ks[9], (HIDDEN_DIM, OUTPUT_DIM), jnp.float32),
        "fc1_b": scale * jax.random.normal(ks[10], (1, OUTPUT_DIM), jnp.float32),
    }


if __name__ == "__main__":
    key = jax.random.PRNGKey(0)
    pkey, tkey = jax.random.split(key)
    params = init_params(pkey)
    slab = pack_params(params)            # one-time packing, outside the hot path
    text = jax.random.randint(tkey, (BATCH, SEQ), 0, VOCAB_SIZE, dtype=jnp.int32)

    fwd = jax.jit(cnn_forward)
    logits = fwd(text, slab)
    jax.block_until_ready(logits)
    assert logits.shape == (BATCH, OUTPUT_DIM), logits.shape

    # correctness check vs. pure-JAX reference (tolerance covers MXU f32 modes)
    ref = cnn_reference(text, params)
    assert jnp.allclose(logits, ref, rtol=1e-2, atol=1e-2), (logits, ref)

    print("KERNEL_OK")
</pallas_src>

<mosaic_0001>
module attributes {stable_mosaic.version = 11 : i64} {
  func.func @cnn_kernel(%arg0: i32, %arg1: memref<32x1xi32, #tpu.memory_space<vmem>>, %arg2: memref<280x128xf32, #tpu.memory_space<vmem>>, %arg3: memref<2x128xf32, #tpu.memory_space<vmem>>) attributes {dimension_semantics = [#tpu.dimension_semantics<parallel>], iteration_bounds = array<i64: 1>, scalar_prefetch = 0 : i64, scratch_operands = 0 : i64, tpu.core_type = #tpu.core_type<tc>, window_params = [{transform_indices = @transform_0, window_bounds = array<i64: 32, 1>}, {pipeline_mode = #tpu.pipeline_mode<synchronous>, transform_indices = @transform_1, window_bounds = array<i64: 280, 128>}, {transform_indices = @transform_2, window_bounds = array<i64: 2, 128>}]} {
    %c0 = arith.constant 0 : index
    %c0_0 = arith.constant 0 : index
    %0 = vector.load %arg1[%c0, %c0_0] : memref<32x1xi32, #tpu.memory_space<vmem>>, vector<32x1xi32>
    %1 = tpu.iota {dimensions = array<i32: 1>} : vector<32x56xi32>
    %2 = vector.broadcast %0 : vector<32x1xi32> to vector<32x56xi32>
    %3 = arith.cmpi eq, %1, %2 : vector<32x56xi32>
    %4 = arith.extui %3 : vector<32x56xi1> to vector<32x56xi32>
    %5 = arith.sitofp %4 : vector<32x56xi32> to vector<32x56xf32>
    %c0_1 = arith.constant 0 : index
    %c0_2 = arith.constant 0 : index
    %6 = vector.load %arg2[%c0_1, %c0_2] : memref<280x128xf32, #tpu.memory_space<vmem>>, vector<56x32xf32>
    %cst = arith.constant dense<0.000000e+00> : vector<32x32xf32>
    %7 = tpu.matmul %5, %6, %cst {dimension_numbers = #tpu.dot_dimension_numbers<[1], [0], [0], [1], [0, 0, 1, 1], [], []>} : vector<32x56xf32>, vector<56x32xf32>, vector<32x32xf32> -> vector<32x32xf32>
    %c56 = arith.constant 56 : index
    %c0_3 = arith.constant 0 : index
    %8 = vector.load %arg2[%c56, %c0_3] : memref<280x128xf32, #tpu.memory_space<vmem>>, vector<32x24xf32>
    %cst_4 = arith.constant dense<0.000000e+00> : vector<32x24xf32>
    %9 = tpu.matmul %7, %8, %cst_4 {dimension_numbers = #tpu.dot_dimension_numbers<[1], [0], [0], [1], [0, 0, 1, 1], [], []>} : vector<32x32xf32>, vector<32x24xf32>, vector<32x24xf32> -> vector<32x24xf32>
    %c88 = arith.constant 88 : index
    %c0_5 = arith.constant 0 : index
    %10 = vector.load %arg2[%c88, %c0_5] : memref<280x128xf32, #tpu.memory_space<vmem>>, vector<32x24xf32>
    %11 = vector.extract_strided_slice %7 {offsets = [1, 0], sizes = [31, 32], strides = [1, 1]} : vector<32x32xf32> to vector<31x32xf32>
    %cst_6 = arith.constant 0.000000e+00 : f32
    %12 = vector.broadcast %cst_6 : f32 to vector<1x32xf32>
    %13 = tpu.concatenate %11, %12 in 0 : vector<31x32xf32>, vector<1x32xf32> -> vector<32x32xf32>
    %cst_7 = arith.constant dense<0.000000e+00> : vector<32x24xf32>
    %14 = tpu.matmul %13, %10, %cst_7 {dimension_numbers = #tpu.dot_dimension_numbers<[1], [0], [0], [1], [0, 0, 1, 1], [], []>} : vector<32x32xf32>, vector<32x24xf32>, vector<32x24xf32> -> vector<32x24xf32>
    %15 = arith.addf %9, %14 : vector<32x24xf32>
    %c120 = arith.constant 120 : index
    %c0_8 = arith.constant 0 : index
    %16 = vector.load %arg2[%c120, %c0_8] : memref<280x128xf32, #tpu.memory_space<vmem>>, vector<32x24xf32>
    %17 = vector.extract_strided_slice %7 {offsets = [2, 0], sizes = [30, 32], strides = [1, 1]} : vector<32x32xf32> to vector<30x32xf32>
    %cst_9 = arith.constant 0.000000e+00 : f32
    %18 = vector.broadcast %cst_9 : f32 to vector<2x32xf32>
    %19 = tpu.concatenate %17, %18 in 0 : vector<30x32xf32>, vector<2x32xf32> -> vector<32x32xf32>
    %cst_10 = arith.constant dense<0.000000e+00> : vector<32x24xf32>
    %20 = tpu.matmul %19, %16, %cst_10 {dimension_numbers = #tpu.dot_dimension_numbers<[1], [0], [0], [1], [0, 0, 1, 1], [], []>} : vector<32x32xf32>, vector<32x24xf32>, vector<32x24xf32> -> vector<32x24xf32>
    %21 = arith.addf %15, %20 : vector<32x24xf32>
    %c152 = arith.constant 152 : index
    %c0_11 = arith.constant 0 : index
    %22 = vector.load %arg2[%c152, %c0_11] : memref<280x128xf32, #tpu.memory_space<vmem>>, vector<32x24xf32>
    %23 = vector.extract_strided_slice %7 {offsets = [3, 0], sizes = [29, 32], strides = [1, 1]} : vector<32x32xf32> to vector<29x32xf32>
    %cst_12 = arith.constant 0.000000e+00 : f32
    %24 = vector.broadcast %cst_12 : f32 to vector<3x32xf32>
    %25 = tpu.concatenate %23, %24 in 0 : vector<29x32xf32>, vector<3x32xf32> -> vector<32x32xf32>
    %cst_13 = arith.constant dense<0.000000e+00> : vector<32x24xf32>
    %26 = tpu.matmul %25, %22, %cst_13 {dimension_numbers = #tpu.dot_dimension_numbers<[1], [0], [0], [1], [0, 0, 1, 1], [], []>} : vector<32x32xf32>, vector<32x24xf32>, vector<32x24xf32> -> vector<32x24xf32>
    %27 = arith.addf %21, %26 : vector<32x24xf32>
    %c184 = arith.constant 184 : index
    %c0_14 = arith.constant 0 : index
    %28 = vector.load %arg2[%c184, %c0_14] : memref<280x128xf32, #tpu.memory_space<vmem>>, vector<32x24xf32>
    %29 = vector.extract_strided_slice %7 {offsets = [4, 0], sizes = [28, 32], strides = [1, 1]} : vector<32x32xf32> to vector<28x32xf32>
    %cst_15 = arith.constant 0.000000e+00 : f32
    %30 = vector.broadcast %cst_15 : f32 to vector<4x32xf32>
    %31 = tpu.concatenate %29, %30 in 0 : vector<28x32xf32>, vector<4x32xf32> -> vector<32x32xf32>
    %cst_16 = arith.constant dense<0.000000e+00> : vector<32x24xf32>
    %32 = tpu.matmul %31, %28, %cst_16 {dimension_numbers = #tpu.dot_dimension_numbers<[1], [0], [0], [1], [0, 0, 1, 1], [], []>} : vector<32x32xf32>, vector<32x24xf32>, vector<32x24xf32> -> vector<32x24xf32>
    %33 = arith.addf %27, %32 : vector<32x24xf32>
    %c272 = arith.constant 272 : index
    %c0_17 = arith.constant 0 : index
    %34 = vector.load %arg2[%c272, %c0_17] : memref<280x128xf32, #tpu.memory_space<vmem>>, vector<1x24xf32>
    %35 = vector.broadcast %34 : vector<1x24xf32> to vector<32x24xf32>
    %36 = arith.addf %33, %35 : vector<32x24xf32>
    %cst_18 = arith.constant 0.000000e+00 : f32
    %37 = vector.broadcast %cst_18 : f32 to vector<32x24xf32>
    %38 = arith.maximumf %36, %37 : vector<32x24xf32>
    %39 = tpu.iota {dimensions = array<i32: 0>} : vector<32x24xi32>
    %c16_i32 = arith.constant 16 : i32
    %c0_i32 = arith.constant 0 : i32
    %40 = arith.cmpi eq, %c16_i32, %c0_i32 : i32
    %c1_i32 = arith.constant 1 : i32
    %41 = arith.select %40, %c1_i32, %c16_i32 : i32
    %42 = vector.broadcast %41 : i32 to vector<32x24xi32>
    %43 = arith.remsi %39, %42 : vector<32x24xi32>
    %c0_i32_19 = arith.constant 0 : i32
    %44 = vector.broadcast %c0_i32_19 : i32 to vector<32x24xi32>
    %45 = arith.cmpi ne, %43, %44 : vector<32x24xi32>
    %c0_i32_20 = arith.constant 0 : i32
    %46 = vector.broadcast %c0_i32_20 : i32 to vector<32x24xi32>
    %47 = arith.cmpi slt, %43, %46 : vector<32x24xi32>
    %c0_i32_21 = arith.constant 0 : i32
    %48 = arith.cmpi slt, %41, %c0_i32_21 : i32
    %49 = vector.broadcast %48 : i1 to vector<32x24xi1>
    %50 = vector.broadcast %49 : vector<32x24xi1> to vector<32x24xi1>
    %51 = arith.xori %47, %50 : vector<32x24xi1>
    %52 = arith.andi %51, %45 : vector<32x24xi1>
    %53 = vector.broadcast %41 : i32 to vector<32x24xi32>
    %54 = arith.addi %43, %53 : vector<32x24xi32>
    %55 = arith.select %52, %54, %43 : vector<32x24xi1>, vector<32x24xi32>
    %c275 = arith.constant 275 : index
    %c0_22 = arith.constant 0 : index
    %56 = vector.load %arg2[%c275, %c0_22] : memref<280x128xf32, #tpu.memory_space<vmem>>, vector<1x24xf32>
    %57 = arith.fptosi %56 : vector<1x24xf32> to vector<1x24xi32>
    %c16_i32_23 = arith.constant 16 : i32
    %58 = vector.broadcast %c16_i32_23 : i32 to vector<1x24xi32>
    %59 = arith.subi %58, %57 : vector<1x24xi32>
    %60 = vector.broadcast %59 : vector<1x24xi32> to vector<32x24xi32>
    %61 = arith.cmpi sle, %55, %60 : vector<32x24xi32>
    %cst_24 = arith.constant 0.000000e+00 : f32
    %62 = vector.broadcast %cst_24 : f32 to vector<32x24xf32>
    %63 = arith.select %61, %38, %62 : vector<32x24xi1>, vector<32x24xf32>
    %64 = vector.shape_cast %63 : vector<32x24xf32> to vector<2x16x24xf32>
    %cst_25 = arith.constant dense<0xFF800000> : vector<2x24xf32>
    %65 = vector.multi_reduction <maximumf>, %64, %cst_25 [1] : vector<2x16x24xf32> to vector<2x24xf32>
    %c216 = arith.constant 216 : index
    %c0_26 = arith.constant 0 : index
    %66 = vector.load %arg2[%c216, %c0_26] : memref<280x128xf32, #tpu.memory_space<vmem>>, vector<24x32xf32>
    %c273 = arith.constant 273 : index
    %c0_27 = arith.constant 0 : index
    %67 = vector.load %arg2[%c273, %c0_27] : memref<280x128xf32, #tpu.memory_space<vmem>>, vector<1x32xf32>
    %cst_28 = arith.constant dense<0.000000e+00> : vector<2x32xf32>
    %68 = tpu.matmul %65, %66, %cst_28 {dimension_numbers = #tpu.dot_dimension_numbers<[1], [0], [0], [1], [0, 0, 1, 1], [], []>} : vector<2x24xf32>, vector<24x32xf32>, vector<2x32xf32> -> vector<2x32xf32>
    %69 = vector.broadcast %67 : vector<1x32xf32> to vector<2x32xf32>
    %70 = arith.addf %68, %69 : vector<2x32xf32>
    %cst_29 = arith.constant 0.000000e+00 : f32
    %71 = vector.broadcast %cst_29 : f32 to vector<2x32xf32>
    %72 = arith.maximumf %70, %71 : vector<2x32xf32>
    %c240 = arith.constant 240 : index
    %c0_30 = arith.constant 0 : index
    %73 = vector.load %arg2[%c240, %c0_30] : memref<280x128xf32, #tpu.memory_space<vmem>>, vector<32x128xf32>
    %c274 = arith.constant 274 : index
    %c0_31 = arith.constant 0 : index
    %74 = vector.load %arg2[%c274, %c0_31] : memref<280x128xf32, #tpu.memory_space<vmem>>, vector<1x128xf32>
    %cst_32 = arith.constant dense<0.000000e+00> : vector<2x128xf32>
    %75 = tpu.matmul %72, %73, %cst_32 {dimension_numbers = #tpu.dot_dimension_numbers<[1], [0], [0], [1], [0, 0, 1, 1], [], []>} : vector<2x32xf32>, vector<32x128xf32>, vector<2x128xf32> -> vector<2x128xf32>
    %76 = vector.broadcast %74 : vector<1x128xf32> to vector<2x128xf32>
    %77 = arith.addf %75, %76 : vector<2x128xf32>
    %c0_33 = arith.constant 0 : index
    %c0_34 = arith.constant 0 : index
    %78 = vector.load %arg3[%c0_33, %c0_34] : memref<2x128xf32, #tpu.memory_space<vmem>>, vector<2x128xf32>
    tpu.vector_store %arg3[%c0_33, %c0_34], %77 {strides = array<i32>} : memref<2x128xf32, #tpu.memory_space<vmem>>, vector<2x128xf32>,
    return
  }
  func.func @transform_0(%arg0: i32) -> (i32, i32) {
    %c0_i32 = arith.constant 0 : i32
    %c0_i32_0 = arith.constant 0 : i32
    return %arg0, %c0_i32 : i32, i32
  }
  func.func @transform_1(%arg0: i32) -> (i32, i32) {
    %c0_i32 = arith.constant 0 : i32
    %c0_i32_0 = arith.constant 0 : i32
    %c0_i32_1 = arith.constant 0 : i32
    return %c0_i32, %c0_i32_0 : i32, i32
  }
  func.func @transform_2(%arg0: i32) -> (i32, i32) {
    %c0_i32 = arith.constant 0 : i32
    %c0_i32_0 = arith.constant 0 : i32
    return %arg0, %c0_i32 : i32, i32
  }
}

</mosaic_0001>

<bundles_post_ra>
// kernel: cnn_forward.1
= control target key start
LH: loop header
LB: loop body
LE: loop exit
PB: predicated region body
PF: predicated region fallthrough
CT: control target
= control target key end

     0   :  { %7 = vsyncpa [#allocation3], 0  ;;  %s1445_s0 = inlined_call_operand.vmem [shape: s32[32,1], index: 0, kind: input, shape index: {}]   ;;  %s1446_s1 = inlined_call_operand.hbm [shape: f32[280,128], index: 1, kind: input, shape index: {}]   ;;  %s1447_s2 = inlined_call_operand.hbm [shape: f32[2,128], index: 2, kind: output, shape index: {}]  }
   0x1   :  { %8 = vsyncpa [#allocation4], 0  ;;  %s1330_s9 = smov [#allocation2]   ;;  %s1282_s13 = scalar_lea.hbm %s1446_s1, 4480 }
   0x2   :  { %s16_s10 = sshll.u32 %s1330_s9, 4  ;;  %p1283_p0 = scmp.ne.s32.totalorder %s1446_s1, %s1282_s13  ;;  %s17_s10 = int_to_ptr.vmem [resolvable:$true] %s16_s10 }
   0x3   :  { %p1286_p1 = scmp.lt.u32.totalorder %s1282_s13, %s1446_s1 }
   0x5   :  { %p1288_p2 = pnand %p1286_p1, %p1283_p0 }
   0x7   :  { %1291 = shalt.err (!%p1288_p2)
}
   0x8   :  { %s1292_s18 = scalar_lea.vmem %s17_s10, 4480  ;;  %p1297_p4 = scmp.lt.s32.totalorder %s17_s10, %s17_s10 }
   0x9   :  { %p1293_p3 = scmp.ne.s32.totalorder %s17_s10, %s1292_s18  ;;  %p1298_p5 = scmp.lt.s32.totalorder %s1292_s18, %s1292_s18 }
   0xb   :  { %p1299_p6 = por %p1298_p5, %p1297_p4 }
   0xd   :  { %p1300_p7 = pnand %p1299_p6, %p1293_p3 }
   0xf   :  { %1303 = shalt.err (!%p1300_p7)
}
  0x10   :  { %s1331_s19 = smov 128   ;;  %s1332_s20 = smov 8  }
  0x11   :  { %22 = dma.hbm_to_vmem [thread:$0]  %s1446_s1, 4480, %s17_s10, [#allocation3], %s1331_s19, %s1331_s19, %s1332_s20  }
  0x12   :  { %1326 = dma.done.wait [#allocation3], 4480  }
  0x13   :  { %1327 = vsyncadd [#allocation3], 4294962816  ;;  %v1333_v0 = vmov 0   ;;  %v28_v1 = vld [vmem:[%s1445_s0 + $0x10] sm:$0xff]  ;;  %v26_v2 = vld [vmem:[%s1445_s0] sm:$0xff]  ;;  %v30_v21 = vlaneseq  ;;  %vm63_vm0 = vcmask 457728  }
  0x14   :  { %1281 = vset.pattern.permute.xlu1 %v1333_v0  ;;  %1280 = vset.pattern.permute.xlu0 %v1333_v0  ;;  %v29_v3 = vld [vmem:[%s1445_s0 + $0x18] sm:$0xff]  ;;  %v56_v4 = vld [vmem:[#allocation2] sm:$0xff]  ;;  %v57_v5 = vld [vmem:[#allocation2 + $0x8] sm:$0xff]  ;;  %v1334_v25 = vmov 0.0   ;;  %vm183_vm5 = vcmask 261120   ;;  %vm173_vm6 = vcmask 1046528  }
  0x15   :  { %39 = vperm.xlu1 %1281, %v28_v1   ;;  %33 = vperm.xlu0 %1280, %v26_v2   ;;  %v27_v6 = vld [vmem:[%s1445_s0 + $0x8] sm:$0xff]  ;;  %v1193_v7 = vpack.c.bf16 %v57_v5, %v56_v4  ;;  %v58_v8 = vld [vmem:[#allocation2 + $0x10] sm:$0xff]  ;;  %v59_v9 = vld [vmem:[#allocation2 + $0x18] sm:$0xff]  ;;  %v31_v22 = vand.u32 127, %v30_v21  ;;  %vm375_vm7 = vcmask 1045504   ;;  %vm487_vm8 = vcmask 1044480  }
  0x16   :  { %v1197_v10 = vpack.c.bf16 %v59_v9, %v58_v8  ;;  %v60_v11 = vld [vmem:[#allocation2 + $0x20] sm:$0xff]  ;;  %v61_v12 = vld [vmem:[#allocation2 + $0x28] sm:$0xff]  ;;  %v161_v14 = vld [vmem:[#allocation2 + $0x38] sm:$0xff]  ;;  %vm599_vm9 = vcmask 1043456   ;;  %vm1336_vm10 = vmmov 0   ;;  %vm788_vm12 = vcmask 195584  }
  0x17   :  { %1194 = vmatprep.subr.bf16.mxu0 %v1193_v7  ;;  %v1201_v13 = vpack.c.bf16 %v61_v12, %v60_v11  ;;  %v162_v15 = vld [vmem:[#allocation2 + $0x40] sm:$0xff]  ;;  %v163_v16 = vld [vmem:[#allocation2 + $0x48] sm:$0xff]  ;;  %v62_v17 = vld [vmem:[#allocation2 + $0x30] sm:$0xff]  ;;  %s1337_s0 = smov [#allocation5]  }
  0x18   :  { %1196 = vmatpush3.bf16.msra.mxu0 %v1193_v7  ;;  %v1213_v18 = vpack.c.bf16 %v162_v15, %v161_v14  ;;  %v164_v19 = vld [vmem:[#allocation2 + $0x50] sm:$0xff]  ;;  %v165_v32 = vld [vmem:[#allocation2 + $0x58] sm:$0xff]  ;;  %v166_v33 = vld [vmem:[#allocation2 + $0x60] sm:$0xff]  ;;  %s981_s30 = sshll.u32 %s1337_s0, 4  ;;  %s982_s30 = int_to_ptr.vmem [resolvable:$true] %s981_s30 }
  0x19   :  { %42 = vperm.xlu1 %1281, %v29_v3   ;;  %36 = vperm.xlu0 %1280, %v27_v6   ;;  %v1217_v20 = vpack.c.bf16 %v164_v19, %v163_v16  ;;  %v1205_v34 = vpack.c.bf16 %v166_v33, %v165_v32  ;;  %v371_v35 = vld [vmem:[#allocation2 + $0x78] sm:$0xff]  ;;  %v372_v36 = vld [vmem:[#allocation2 + $0x80] sm:$0xff]  ;;  %v167_v38 = vld [vmem:[#allocation2 + $0x68] sm:$0xff]  ;;  %v1335_v33 = vmov 0.0|0.0   ;;  %s1304_s3 = scalar_lea.vmem %s982_s30, 32  ;;  %p1309_p9 = scmp.lt.s32.totalorder %s982_s30, %s982_s30 }
  0x1a   :  { %1198 = vmatprep.subr.bf16.mxu0 %v1197_v10  ;;  %1214 = vmatprep.subr.bf16.mxu1 %v1213_v18  ;;  %v1221_v37 = vpack.c.bf16 %v372_v36, %v371_v35  ;;  %v168_v39 = vld [vmem:[#allocation2 + $0x70] sm:$0xff]  ;;  %v373_v41 = vld [vmem:[#allocation2 + $0x88] sm:$0xff]  ;;  %v483_v45 = vld [vmem:[#allocation2 + $0x98] sm:$0xff]  ;;  %p1305_p8 = scmp.ne.s32.totalorder %s982_s30, %s1304_s3  ;;  %p1310_p10 = scmp.lt.s32.totalorder %s1304_s3, %s1304_s3 }
  0x1b   :  { %1216 = vmatpush3.bf16.msra.mxu1 %v1213_v18  ;;  %v1209_v40 = vpack.c.bf16 %v168_v39, %v167_v38  ;;  %v374_v42 = vld [vmem:[#allocation2 + $0x90] sm:$0xff]  ;;  %v484_v46 = vld [vmem:[#allocation2 + $0xa0] sm:$0xff]  ;;  %v485_v60 = vld [vmem:[#allocation2 + $0xa8] sm:$0xff] }
  0x1c   :  { %1200 = vmatpush3.bf16.msra.mxu0 %v1197_v10  ;;  %1218 = vmatprep.subr.bf16.mxu1 %v1217_v20  ;;  %v1225_v44 = vpack.c.bf16 %v374_v42, %v373_v41  ;;  %v1229_v56 = vpack.c.bf16 %v484_v46, %v483_v45  ;;  %v486_v61 = vld [vmem:[#allocation2 + $0xb0] sm:$0xff]  ;;  %v595_v16 = vld [vmem:[#allocation2 + $0xb8] sm:$0xff]  ;;  %v721_v41 = vshrl.u32 %v30_v21, 7  ;;  %p1311_p11 = por %p1310_p10, %p1309_p9 }
  0x1d   :  { %1202 = vmatprep.subr.bf16.mxu0 %v1201_v13  ;;  %v1233_v9 = vpack.c.bf16 %v486_v61, %v485_v60 }
  0x1e   :  { %v778_v45 = vsub.s32 0, %v721_v41  ;;  %p1312_p12 = pnand %p1311_p11, %p1305_p8 }
  0x1f   :  { %1220 = vmatpush3.bf16.msra.mxu1 %v1217_v20 }
  0x20   :  { %1204 = vmatpush3.bf16.msra.mxu0 %v1201_v13  ;;  %1222 = vmatprep.subr.bf16.mxu1 %v1221_v37 }
  0x21   :  { %1095 = vmatprep.subr.mxu0 %v62_v17 }
  0x24   :  { %1096 = vmatpush3.msra.mxu0 %v62_v17  ;;  %v596_v17 = vld [vmem:[#allocation2 + $0xc0] sm:$0xff] }
  0x25   :  { %1206 = vmatprep.subr.bf16.mxu0 %v1205_v34 }
  0x94   :  { %v40_v23 = vpop.permute.xlu1 %39  ;;  %v34_v24 = vpop.permute.xlu0 %33 }
  0x95   :  { %vm44_vm1 = vcmp.eq.s32.totalorder %v31_v22, %v34_v24  ;;  %vm46_vm2 = vcmp.eq.s32.totalorder %v31_v22, %v40_v23  ;;  %v597_v24 = vld [vmem:[#allocation2 + $0xc8] sm:$0xff] }
  0x96   :  { %v990_v26 = vsel %vm44_vm1, 1.0, %v1334_v25  ;;  %v992_v29 = vsel %vm46_vm2, 1.0, %v1334_v25 }
  0x97   :  { %1097 = vmatprep.mubr.msk.f32.mxu0 %vm63_vm0, %v990_v26  ;;  %v598_v26 = vld [vmem:[#allocation2 + $0xd0] sm:$0xff] }
  0x98   :  { %v43_v27 = vpop.permute.xlu1 %42  ;;  %v37_v28 = vpop.permute.xlu0 %36 }
  0x99   :  { %vm45_vm3 = vcmp.eq.s32.totalorder %v31_v22, %v37_v28  ;;  %vm47_vm4 = vcmp.eq.s32.totalorder %v31_v22, %v43_v27  ;;  %v1237_v22 = vpack.c.bf16 %v596_v17, %v595_v16  ;;  %v1241_v27 = vpack.c.bf16 %v598_v26, %v597_v24  ;;  %v892_v26 = vld [vmem:[#allocation2 + $0xf0] sm:$0xff] }
  0x9a   :  { %v991_v30 = vsel %vm45_vm3, 1.0, %v1334_v25  ;;  %v993_v31 = vsel %vm47_vm4, 1.0, %v1334_v25 }
  0x9b   :  { %1098 = vmatmul.mubr.msk.f32.vlgmr.msra.gmra.mrb[0].mxu0 %vm63_vm0, %v991_v30  ;;  %v807_v30 = vld [vmem:[#allocation2 + $0xd8] sm:$0xff] }
  0x9c   :  { %1100 = vmatprep.mubr.msk.f32.mxu0 %vm63_vm0, %v992_v29  ;;  %1208 = vmatpush3.bf16.msra.mxu0 %v1205_v34  ;;  %v809_v34 = vld [vmem:[#allocation2 + $0xe8] sm:$0xff] }
  0x9d   :  { %1210 = vmatprep.subr.bf16.mxu0 %v1209_v40 }
  0x9f   :  { %1101 = vmatmul.mubr.msk.f32.gmra.mrb[2].mxu0 %vm63_vm0, %v993_v31  ;;  %v808_v31 = vld [vmem:[#allocation2 + $0xe0] sm:$0xff]  ;;  %vm817_vm0 = vcmask 1041409  }
  0xa0   :  { %1212 = vmatpush3.bf16.msra.mxu0 %v1209_v40  ;;  %v1246_v32 = vpack.c.bf16 %v808_v31, %v807_v30 }
  0xa1   :  { %1245 = vmatprep.subr.bf16.mxu0 %v1335_v33 }
 0x16e   :  { %v1099_v43 = vpop.f32.mrb[0].mxu0 }
 0x16f   :  { %v142_v47 = vpop.f32.mrb[1].mxu0  ;;  %v175_v48 = vrot.slane %v1099_v43, 1  ;;  %v377_v49 = vrot.slane %v1099_v43, 2  ;;  %v489_v50 = vrot.slane %v1099_v43, 3  ;;  %v601_v51 = vrot.slane %v1099_v43, 4 }
 0x170   :  { %1125 = vmatprep.mubr.msk.f32.mxu1 %vm183_vm5, %v142_v47  ;;  %v174_v52 = vrot.slane %v142_v47, 1  ;;  %v376_v53 = vrot.slane %v142_v47, 2  ;;  %v488_v54 = vrot.slane %v142_v47, 3  ;;  %v600_v55 = vrot.slane %v142_v47, 4  ;;  %v1018_v47 = vld [vmem:[#allocation2 + $0x110] ss:$0 sm:$0xff] }
 0x171   :  { %1126 = vmatmul.mubr.msk.f32.vlgmr.msra.gmra.mrb[0].mxu1 %vm183_vm5, %v1099_v43  ;;  %v722_v43 = vadd.s32 8, %v721_v41 }
 0x172   :  { %1224 = vmatpush3.bf16.msra.mxu1 %v1221_v37  ;;  %v1102_v57 = vpop.f32.mrb[2].mxu0  ;;  %v176_v58 = vsel %vm173_vm6, %v174_v52, %v175_v48  ;;  %v378_v59 = vsel %vm375_vm7, %v376_v53, %v377_v49  ;;  %v490_v62 = vsel %vm487_vm8, %v488_v54, %v489_v50  ;;  %v602_v63 = vsel %vm599_vm9, %v600_v55, %v601_v51  ;;  %v773_v37 = vld [vmem:[#allocation2 + $0x113] sm:$0x1] }
 0x173   :  { %v152_v0 = vpop.f32.mrb[3].mxu0  ;;  %1111 = vmatprep.mubr.msk.f32.mxu0 %vm183_vm5, %v176_v58  ;;  %1226 = vmatprep.subr.bf16.mxu1 %v1225_v44  ;;  %v179_v1 = vrot.slane %v1102_v57, 1  ;;  %v381_v2 = vrot.slane %v1102_v57, 2  ;;  %v493_v3 = vrot.slane %v1102_v57, 3  ;;  %v605_v4 = vrot.slane %v1102_v57, 4 }
 0x174   :  { %v177_v5 = vrot.slane %v152_v0, 1  ;;  %v379_v6 = vrot.slane %v152_v0, 2  ;;  %v491_v7 = vrot.slane %v152_v0, 3  ;;  %v603_v8 = vrot.slane %v152_v0, 4  ;;  %1128 = vmatprep.mubr.msk.f32.mxu1 %vm183_vm5, %v152_v0 }
 0x175   :  { %1129 = vmatmul.mubr.msk.f32.gmra.mrb[2].mxu1 %vm183_vm5, %v1102_v57  ;;  %v182_v20 = vsel %vm173_vm6, %v179_v1, 0.0  ;;  %v384_v23 = vsel %vm375_vm7, %v381_v2, 0.0  ;;  %v496_v28 = vsel %vm487_vm8, %v493_v3, 0.0  ;;  %v608_v29 = vsel %vm599_vm9, %v605_v4, 0.0 }
 0x176   :  { %1228 = vmatpush3.bf16.msra.mxu1 %v1225_v44  ;;  %1139 = vmatprep.mubr.msk.f32.mxu1 %vm183_vm5, %v378_v59  ;;  %v178_v10 = vsel %vm173_vm6, %v175_v48, %v177_v5  ;;  %v180_v11 = vsel %vm173_vm6, %v177_v5, %v179_v1  ;;  %v380_v12 = vsel %vm375_vm7, %v377_v49, %v379_v6  ;;  %v1270_v40 = vtrunc.f32 %v773_v37  ;;  %v1019_v37 = vld [vmem:[#allocation2 + $0x111] ss:$0 sm:$0xff] }
 0x177   :  { %1112 = vmatmul.mubr.msk.f32.vlgmr.msra.gmra.mrb[4].mxu0 %vm183_vm5, %v178_v10  ;;  %1230 = vmatprep.subr.bf16.mxu1 %v1229_v56  ;;  %v382_v13 = vsel %vm375_vm7, %v379_v6, %v381_v2  ;;  %v492_v14 = vsel %vm487_vm8, %v489_v50, %v491_v7  ;;  %v494_v15 = vsel %vm487_vm8, %v491_v7, %v493_v3  ;;  %v736_v48 = vand.u32 15, %v722_v43 }
 0x178   :  { %1114 = vmatprep.mubr.msk.f32.mxu0 %vm183_vm5, %v180_v11  ;;  %v604_v18 = vsel %vm599_vm9, %v601_v51, %v603_v8  ;;  %v606_v19 = vsel %vm599_vm9, %v603_v8, %v605_v4  ;;  %1247 = vmatpush3.bf16.msra.mxu0 %v1246_v32  ;;  %v1271_v42 = vcvt.f32.s32 %v1270_v40  ;;  %v724_v50 = vadd.s32 24, %v721_v41 }
 0x179   :  { %1140 = vmatmul.mubr.msk.f32.vlgmr.msra.gmra.mrb[0].mxu1 %vm183_vm5, %v380_v12  ;;  %1177 = vmatprep.subr.mxu0 %v1334_v25  ;;  %v729_v53 = vand.u32 15, %v721_v41  ;;  %v723_v54 = vadd.s32 16, %v721_v41 }
 0x17a   :  { %1232 = vmatpush3.bf16.msra.mxu1 %v1229_v56  ;;  %1142 = vmatprep.mubr.msk.f32.mxu1 %vm183_vm5, %v382_v13  ;;  %v775_v44 = vsub.s32 16, %v1271_v42  ;;  %v750_v21 = vand.u32 15, %v724_v50  ;;  %v1021_v42 = vld [vmem:[#allocation2 + $0x112] ss:$0 sm:$0xff] }
 0x17b   :  { %1115 = vmatmul.mubr.msk.f32.gmra.mrb[6].mxu0 %vm183_vm5, %v182_v20  ;;  %1234 = vmatprep.subr.bf16.mxu1 %v1233_v9 }
 0x17c   :  { %1179 = vmatprep.mubr.msk.f32.mxu0 %vm1336_vm10, %v1334_v25  ;;  %1178 = vmatpush3.msra.mxu0 %v809_v34  ;;  %v779_v49 = vrot.slane %v775_v44, %v778_v45  ;;  %v894_v34 = vld [vmem:[#allocation2 + $0x100] sm:$0xff] }
 0x17d   :  { %1143 = vmatmul.mubr.msk.f32.gmra.mrb[2].mxu1 %vm183_vm5, %v384_v23  ;;  %1248 = vmatprep.subr.bf16.mxu0 %v1335_v33 }
 0x17e   :  { %1236 = vmatpush3.bf16.msra.mxu1 %v1233_v9  ;;  %1153 = vmatprep.mubr.msk.f32.mxu1 %vm183_vm5, %v490_v62  ;;  %vm781_vm11 = vcmp.le.s32.totalorder %v736_v48, %v779_v49  ;;  %vm780_vm13 = vcmp.le.s32.totalorder %v729_v53, %v779_v49  ;;  %v743_v62 = vand.u32 15, %v723_v54  ;;  %vm783_vm14 = vcmp.le.s32.totalorder %v750_v21, %v779_v49 }
 0x17f   :  { %1238 = vmatprep.subr.bf16.mxu1 %v1237_v22 }
 0x180   :  { %vm782_vm15 = vcmp.le.s32.totalorder %v743_v62, %v779_v49 }
 0x181   :  { %1154 = vmatmul.mubr.msk.f32.vlgmr.msra.gmra.mrb[0].mxu1 %vm183_vm5, %v492_v14 }
 0x182   :  { %1240 = vmatpush3.bf16.msra.mxu1 %v1237_v22  ;;  %1156 = vmatprep.mubr.msk.f32.mxu1 %vm183_vm5, %v494_v15 }
 0x183   :  { %1242 = vmatprep.subr.bf16.mxu1 %v1241_v27 }
 0x185   :  { %1157 = vmatmul.mubr.msk.f32.gmra.mrb[2].mxu1 %vm183_vm5, %v496_v28 }
 0x186   :  { %1244 = vmatpush3.bf16.msra.mxu1 %v1241_v27  ;;  %1167 = vmatprep.mubr.msk.f32.mxu1 %vm183_vm5, %v602_v63  ;;  %v893_v27 = vld [vmem:[#allocation2 + $0xf8] sm:$0xff] }
 0x187   :  { %v1249_v31 = vpack.c.bf16 %v893_v27, %v892_v26 }
 0x189   :  { %1168 = vmatmul.mubr.msk.f32.vlgmr.msra.gmra.mrb[0].mxu1 %vm183_vm5, %v604_v18 }
 0x18a   :  { %1170 = vmatprep.mubr.msk.f32.mxu1 %vm183_vm5, %v606_v19 }
 0x18d   :  { %1171 = vmatmul.mubr.msk.f32.gmra.mrb[2].mxu1 %vm183_vm5, %v608_v29 }
 0x24a   :  { %v1113_v35 = vpop.f32.mrb[4].mxu0 }
 0x24b   :  { %v259_v36 = vpop.f32.mrb[5].mxu0 }
 0x24e   :  { %v1116_v38 = vpop.f32.mrb[6].mxu0 }
 0x24f   :  { %v269_v39 = vpop.f32.mrb[7].mxu0 }
 0x25c   :  { %v1169_v46 = vpop.f32.mrb[0].mxu1 }
 0x25d   :  { %v1254_v51 = vadd.f32 %v1169_v46, %v1113_v35  ;;  %v684_v52 = vpop.f32.mrb[1].mxu1  ;;  %v895_v35 = vld [vmem:[#allocation2 + $0x108] sm:$0xff] }
 0x25e   :  { %v1255_v55 = vadd.f32 %v684_v52, %v259_v36  ;;  %v1252_v36 = vpack.c.bf16 %v895_v35, %v894_v34 }
 0x25f   :  { %v713_v56 = vadd.f32 %v1254_v51, %v1018_v47 }
 0x260   :  { %v712_v57 = vadd.f32 %v1255_v55, %v1018_v47  ;;  %v1172_v58 = vpop.f32.mrb[2].mxu1 }
 0x261   :  { %v717_v59 = vmax.f32 %v713_v56, 0.0  ;;  %v1256_v60 = vadd.f32 %v1172_v58, %v1116_v38  ;;  %v694_v61 = vpop.f32.mrb[3].mxu1 }
 0x262   :  { %v716_v63 = vmax.f32 %v712_v57, 0.0  ;;  %v1257_v0 = vadd.f32 %v694_v61, %v269_v39 }
 0x263   :  { %v785_v1 = vsel %vm781_vm11, %v717_v59, 0.0  ;;  %v715_v2 = vadd.f32 %v1256_v60, %v1018_v47 }
 0x264   :  { %v790_v3 = vsel %vm788_vm12, %v785_v1, -inf  ;;  %v784_v4 = vsel %vm780_vm13, %v716_v63, 0.0  ;;  %v714_v5 = vadd.f32 %v1257_v0, %v1018_v47 }
 0x265   :  { %v789_v6 = vsel %vm788_vm12, %v784_v4, -inf  ;;  %v719_v7 = vmax.f32 %v715_v2, 0.0 }
 0x266   :  { %v791_v8 = vmax.f32 %v789_v6, %v790_v3  ;;  %v718_v9 = vmax.f32 %v714_v5, 0.0 }
 0x267   :  { %v787_v10 = vsel %vm783_vm14, %v719_v7, 0.0 }
 0x268   :  { %v792_v11 = vrot.slane %v791_v8, 4  ;;  %v799_v12 = vsel %vm788_vm12, %v787_v10, -inf  ;;  %v786_v13 = vsel %vm782_vm15, %v718_v9, 0.0 }
 0x269   :  { %v798_v14 = vsel %vm788_vm12, %v786_v13, -inf }
 0x26a   :  { %v793_v15 = vmax.f32 %v791_v8, %v792_v11  ;;  %v800_v16 = vmax.f32 %v798_v14, %v799_v12 }
 0x26c   :  { %v794_v17 = vrot.slane %v793_v15, 2  ;;  %v801_v18 = vrot.slane %v800_v16, 4 }
 0x26e   :  { %v795_v19 = vmax.f32 %v793_v15, %v794_v17  ;;  %v802_v20 = vmax.f32 %v800_v16, %v801_v18 }
 0x270   :  { %v803_v22 = vrot.slane %v802_v20, 2  ;;  %v796_v23 = vrot.slane %v795_v19, 1 }
 0x272   :  { %v804_v24 = vmax.f32 %v802_v20, %v803_v22  ;;  %v797_v29 = vmax.f32 %v795_v19, %v796_v23 }
 0x274   :  { %v805_v28 = vrot.slane %v804_v24, 1 }
 0x276   :  { %v806_v30 = vmax.f32 %v804_v24, %v805_v28 }
 0x278   :  { %v818_v32 = vsel %vm817_vm0, %v806_v30, %v797_v29 }
 0x279   :  { %1180 = vmatmul.mubr.msk.f32.vlgmr.msra.gmra.mrb[8].mxu0 %vm788_vm12, %v818_v32 }
 0x27a   :  { %1250 = vmatpush3.bf16.msra.mxu0 %v1249_v31  ;;  %1190 = vmatprep.mubr.msk.f32.mxu0 %vm1336_vm10, %v1334_v25 }
 0x27b   :  { %1251 = vmatprep.subr.bf16.mxu0 %v1335_v33 }
 0x27e   :  { %1253 = vmatpush3.bf16.msra.mxu0 %v1252_v36 }
 0x34c   :  { %v887_v38 = vpop.f32.mrb[8].mxu0 }
 0x34d   :  { %v888_v39 = vadd.f32 %v1019_v37, %v887_v38  ;;  %v1181_v40 = vpop.f32.mrb[9].mxu0 }
 0x34f   :  { %v891_v41 = vmax.f32 %v888_v39, 0.0 }
 0x351   :  { %1191 = vmatmul.mubr.msk.f32.vlgmr.msra.gmra.mrb[10].mxu0 %vm183_vm5, %v891_v41 }
 0x424   :  { %v970_v43 = vpop.f32.mrb[10].mxu0 }
 0x425   :  { %v971_v44 = vadd.f32 %v1021_v42, %v970_v43  ;;  %v1192_v45 = vpop.f32.mrb[11].mxu0 }
 0x427   :  { %974 = vst [vmem:[#allocation5] sm:$0x3] %v971_v44 }
 0x428   :  { %1315 = shalt.err (!%p1312_p12)
}
 0x429   :  { %s1316_s6 = scalar_lea.hbm %s1447_s2, 32 }
 0x42a   :  { %p1317_p13 = scmp.ne.s32.totalorder %s1447_s2, %s1316_s6  ;;  %p1320_p0 = scmp.lt.u32.totalorder %s1316_s6, %s1447_s2 }
 0x42c   :  { %p1322_p1 = pnand %p1320_p0, %p1317_p13 }
 0x42e   :  { %1325 = shalt.err (!%p1322_p1)
}
 0x42f   :  { %984 = dma.vmem_to_hbm [thread:$0]  %s982_s30, 32, %s1447_s2, [#allocation4]  }
 0x430   :  { %1328 = dma.done.wait [#allocation4], 32  }
 0x431   :  { %1329 = vsyncadd [#allocation4], 4294967264 }
 0x432   :  { %988 = vsyncpa [#allocation3], 1 }
 0x433   :  { %989 = vsyncpa [#allocation4], 1 }

</bundles_post_ra>
